<compile_context>
chip_gen: v6e
topology: v6e:2x2x1
jax: 0.10.0
libtpu: 0.0.40
codegen_flags: <defaults>
</compile_context>

<pallas_src>
import jax
import jax.numpy as jnp
from jax.experimental import pallas as pl
from jax.experimental.pallas import tpu as pltpu

_MIB = 1024 * 1024


def _transpose_hw_kernel(x_ref, o_ref):
    # x_ref: (TC, TH, TW) VMEM tile  ->  o_ref: (TC, TW, TH) VMEM tile
    # TODO(synk): if a bundle dump shows the XLU (vxpose) slot binding on
    # v6e/v7x, route the intra-tile transpose through the idle MXU instead
    # (dot with a TH x TH identity is exact for a permutation).
    o_ref[...] = jnp.swapaxes(x_ref[...], 1, 2)


def _vmem_plan():
    """Generation-aware (tile-footprint budget, vmem_limit_bytes)."""
    try:
        phys = pltpu.get_tpu_info().vmem_capacity_bytes
    except Exception:  # API unavailable / not on a TPU at trace time
        phys = 64 * _MIB  # most conservative real chip (v7x per-TC)
    if phys >= 128 * _MIB:            # v5e / v6e: 128 MiB physical VMEM
        return 48 * _MIB, 64 * _MIB
    # v7x-class: 64 MiB physical per TensorCore -> leave scratch headroom
    return 36 * _MIB, 48 * _MIB


def _pick_spatial_tile(dim, target=512, lane=128):
    """Largest multiple of `lane` dividing `dim` and <= target; else full extent.

    A 128-multiple tile keeps both the input tile and the transposed output
    tile lane-dense (unmasked vld/vst). Full extent is always layout-legal.
    """
    d = (min(dim, target) // lane) * lane
    while d >= lane:
        if dim % d == 0:
            return d
        d -= lane
    return dim


def _pick_channel_tile(nc, slice_bytes, budget_bytes, spatial_steps, min_steps=8):
    """Largest divisor of nc whose double-buffered in+out tiles fit the budget
    while keeping the grid pipelinable and the leading axis TC-shardable."""
    per_channel = max(1, 4 * slice_bytes)          # (in + out) x double-buffer
    tc = min(nc, max(1, budget_bytes // per_channel))
    while tc > 1 and nc % tc != 0:                 # snap to a divisor of nc
        tc -= 1

    def good(t):
        lead = nc // t
        enough_steps = lead * spatial_steps >= min_steps   # software pipelining
        shardable = lead >= 2 or nc == 1                    # v7x dual-TC sharding
        return enough_steps and shardable

    while tc > 1 and not good(tc):
        tc -= 1
        while tc > 1 and nc % tc != 0:
            tc -= 1
    return max(1, tc)


def transform_h_to_v(x, rev=False, force_pallas=False):
    """Pallas equivalent of TransformHtoV.forward.

    Args:
      x: list/tuple with a single NCHW array (matching the torch module).
      rev: unused (the torch forward ignores it too — the op is an involution).
      force_pallas: run the Pallas kernel even for non-lane-aligned shapes
        (otherwise those fall back to jnp.transpose so XLA can fuse them).

    Returns:
      [y] where y = x[0] with its last two axes swapped: (N, C, W, H).
    """
    a = x[0]
    N, C, H, W = a.shape
    dsize = jnp.dtype(a.dtype).itemsize

    # Lane-density escape hatch: H is the OUTPUT lane dim, W the input lane
    # dim. If either is not a clean multiple of 128, a standalone Pallas
    # transpose would emit masked partial loads/stores — let XLA fuse instead.
    if not force_pallas and (H % 128 != 0 or W % 128 != 0):
        return [jnp.transpose(a, (0, 1, 3, 2))]

    nc = N * C
    a3 = a.reshape(nc, H, W)  # contiguous -> free relayout at the wrapper

    th = _pick_spatial_tile(H)
    tw = _pick_spatial_tile(W)
    spatial_steps = (H // th) * (W // tw)

    budget, vmem_limit = _vmem_plan()
    tc = _pick_channel_tile(nc, th * tw * dsize, budget, spatial_steps)

    # Grid: H-tile index innermost so consecutive steps write contiguous
    # stripes along the output's last (H) dim; the leading nc//tc axis is the
    # fat parallel axis for megacore sharding. All axes produce independent
    # output tiles -> "parallel" everywhere.
    grid = (nc // tc, W // tw, H // th)

    out3 = pl.pallas_call(
        _transpose_hw_kernel,
        out_shape=jax.ShapeDtypeStruct((nc, W, H), a.dtype),
        grid=grid,
        in_specs=[pl.BlockSpec((tc, th, tw), lambda b, j, i: (b, i, j))],
        out_specs=pl.BlockSpec((tc, tw, th), lambda b, j, i: (b, j, i)),
        compiler_params=pltpu.CompilerParams(
            dimension_semantics=("parallel", "parallel", "parallel"),
            vmem_limit_bytes=vmem_limit,
        ),
        cost_estimate=pl.CostEstimate(
            flops=0,
            transcendentals=0,
            bytes_accessed=2 * nc * H * W * dsize,
        ),
    )(a3)

    return [out3.reshape(N, C, W, H)]


def transform_h_to_v_jacobian(x, rev=False):
    # Pure permutation -> log|det J| = 0, as in the torch module.
    return 0.0


if __name__ == "__main__":
    key = jax.random.PRNGKey(0)
    k_small, k_big, k_odd = jax.random.split(key, 3)

    # 1) Small NCHW input matching the module's conv-style 4D convention.
    #    Force the Pallas path so the kernel itself is exercised (the wrapper
    #    would otherwise hand this tiny permute to XLA).
    x_small = jax.random.normal(k_small, (2, 4, 16, 16), dtype=jnp.float32)
    y_small = jax.block_until_ready(transform_h_to_v([x_small], force_pallas=True)[0])
    ref_small = jnp.transpose(x_small, (0, 1, 3, 2))
    assert y_small.shape == (2, 4, 16, 16)
    assert jnp.array_equal(y_small, ref_small), "small-shape mismatch vs reference"

    # 2) Lane-aligned shape exercising channel blocking, 128-multiple H/W
    #    tiles, and the anti-collapse grid sizing (leading axis >= 2).
    x_big = jax.random.normal(k_big, (2, 8, 128, 256), dtype=jnp.float32)
    y_big = jax.block_until_ready(transform_h_to_v([x_big])[0])
    ref_big = jnp.transpose(x_big, (0, 1, 3, 2))
    assert y_big.shape == (2, 8, 256, 128)
    assert jnp.array_equal(y_big, ref_big), "tiled-shape mismatch vs reference"

    # 3) Non-128-aligned H: takes the XLA-fusion fallback path (lane-density
    #    escape hatch) — semantics must still match.
    x_odd = jax.random.normal(k_odd, (2, 4, 64, 192), dtype=jnp.float32)
    y_odd = jax.block_until_ready(transform_h_to_v([x_odd])[0])
    ref_odd = jnp.transpose(x_odd, (0, 1, 3, 2))
    assert y_odd.shape == (2, 4, 192, 64)
    assert jnp.array_equal(y_odd, ref_odd), "fallback-shape mismatch vs reference"

    print("KERNEL_OK")
</pallas_src>

<mosaic_0001>
module attributes {stable_mosaic.version = 11 : i64} {
  func.func @_transpose_hw_kernel(%arg0: i32, %arg1: i32, %arg2: i32, %arg3: memref<1x16x16xf32, #tpu.memory_space<vmem>>, %arg4: memref<1x16x16xf32, #tpu.memory_space<vmem>>) attributes {dimension_semantics = [#tpu.dimension_semantics<parallel>, #tpu.dimension_semantics<parallel>, #tpu.dimension_semantics<parallel>], iteration_bounds = array<i64: 8, 1, 1>, scalar_prefetch = 0 : i64, scratch_operands = 0 : i64, tpu.core_type = #tpu.core_type<tc>, window_params = [{transform_indices = @transform_0, window_bounds = array<i64: 1, 16, 16>}, {transform_indices = @transform_1, window_bounds = array<i64: 1, 16, 16>}]} {
    %c0 = arith.constant 0 : index
    %c0_0 = arith.constant 0 : index
    %c0_1 = arith.constant 0 : index
    %0 = vector.load %arg3[%c0, %c0_0, %c0_1] : memref<1x16x16xf32, #tpu.memory_space<vmem>>, vector<1x16x16xf32>
    %1 = tpu.transpose %0, [0, 2, 1] : vector<1x16x16xf32> -> vector<1x16x16xf32>
    %c0_2 = arith.constant 0 : index
    %c0_3 = arith.constant 0 : index
    %c0_4 = arith.constant 0 : index
    %2 = vector.load %arg4[%c0_2, %c0_3, %c0_4] : memref<1x16x16xf32, #tpu.memory_space<vmem>>, vector<1x16x16xf32>
    tpu.vector_store %arg4[%c0_2, %c0_3, %c0_4], %1 {strides = array<i32>} : memref<1x16x16xf32, #tpu.memory_space<vmem>>, vector<1x16x16xf32>,
    return
  }
  func.func @transform_0(%arg0: i32, %arg1: i32, %arg2: i32) -> (i32, i32, i32) {
    %c0_i32 = arith.constant 0 : i32
    return %arg0, %arg2, %arg1 : i32, i32, i32
  }
  func.func @transform_1(%arg0: i32, %arg1: i32, %arg2: i32) -> (i32, i32, i32) {
    %c0_i32 = arith.constant 0 : i32
    return %arg0, %arg1, %arg2 : i32, i32, i32
  }
}

</mosaic_0001>

<bundles_post_ra>
// kernel: tpu_custom_call.1
= control target key start
LH: loop header
LB: loop body
LE: loop exit
PB: predicated region body
PF: predicated region fallthrough
CT: control target
= control target key end

     0   :  { %6 = vsyncpa [#allocation3], 0  ;;  %s667_s0 = inlined_call_operand.hbm [shape: f32[8,16,16], index: 0, kind: input, shape index: {}]   ;;  %s668_s1 = inlined_call_operand.hbm [shape: f32[8,16,16], index: 1, kind: output, shape index: {}]  }
   0x1   :  { %8 = vsyncpa [#allocation3 + $0x1], 0 }
   0x2   :  { %9 = vsyncpa [#allocation4], 0 }
   0x3   :  { %11 = vsyncpa [#allocation4 + $0x1], 0  ;;  %s523_s6 = smov 0   ;;  %s525_s7 = smov 0  }
   0x4   :  { %s527_s8 = smov 0   ;;  %s529_s9 = smov 0  }
   0x5   :  { %s531_s10 = smov 0   ;;  %s533_s11 = smov 0  }
   0x6 LB: > { %s313_s12 = sadd.s32 4294967295, %s505_s11   ;;  %s314_s13 = sadd.s32 4294967294, %s505_s11   ;;  %s505_s11 = sphi %s533_s11, %s17_s11   ;;  %s501_s10 = sphi %s531_s10, %s678_s10   ;;  %s497_s9 = sphi %s529_s9, %s677_s9   ;;  %s493_s8 = sphi %s527_s8, %s676_s8   ;;  %s489_s7 = sphi %s525_s7, %s675_s7   ;;  %s485_s6 = sphi %s523_s6, %s674_s6  }
   0x7   : > { %s36_s14 = sadd.s32 1, %s501_s10  ;;  %s47_s15 = sadd.s32 1, %s493_s8 }
   0x8   : > { %p38_p0 = scmp.ge.s32.totalorder %s36_s14, 8  ;;  %p54_p1 = scmp.ne.s32.totalorder %s493_s8, %s489_s7 }
   0x9   : > { %p55_p2 = scmp.eq.s32.totalorder %s505_s11, 0  ;;  %p60_p3 = scmp.ne.s32.totalorder %s489_s7, %s485_s6 }
   0xa   : > { %s680_s14 = smov (%p38_p0, %s36_s14), 0  ;;  %p61_p5 = scmp.eq.s32.totalorder %s313_s12, 0 }
   0xb   : > { %p564_p4 = por %p55_p2, %p54_p1  ;;  %s40_s17 = ssub.s32 %s501_s10, %s680_s14 }
   0xc   : > { %p88_p6 = scmp.eq.s32.totalorder %s313_s12, 7  ;;  %p45_p7 = scmp.eq.s32.totalorder %s40_s17, 0 }
   0xd   : > { %p570_p8 = por %p61_p5, %p60_p3  ;;  %p94_p10 = scmp.eq.s32.totalorder %s314_s13, 7 }
   0xe   : > { %p574_p9 = por %p88_p6, %p54_p1  ;;  %p342_p12 = scmp.lt.s32.totalorder %s505_s11, 8 }
   0xf   : > { %s579_s20 = scalar_select %p45_p7, %s493_s8, %s47_s15  }
  0x10   : > { %p581_p11 = por %p94_p10, %p60_p3  ;;  %s114_s22 = sand.u32 1, %s493_s8  }
  0x11   : > { %s317_s23 = sshll.u32 %s114_s22, 4  ;;  %s328_s24 = sshll.u32 %s501_s10, 8 }
  0x12   : > { %s127_s27 = scalar_lea.hbm %s667_s0, %s328_s24  ;;  %s118_s28 = scalar_lea.vmem [#allocation2], %s317_s23 }
  0x13   : > { %s128_s29 = sshll.u32 %s118_s28, 4  ;;  %p593_p13 = pnand %p342_p12, %p564_p4  ;;  %s129_s29 = int_to_ptr.vmem [resolvable:$true] %s128_s29 }
  0x14   : > { %p320_p0 = scmp.ge.s32.totalorder %s505_s11, 1  ;;  %s115_s2 = scalar_lea.sflag [#allocation3], %s114_s22 }
  0x15   : > { %p399_p1 = pneg %p593_p13  ;;  %s410_s3 = scalar_lea.vmem %s129_s29, 256 }
  0x16   : > { %p411_p2 = scmp.ne.s32.totalorder %s129_s29, %s410_s3  ;;  %s507_s4 = smov [#allocation2]  }
  0x17   : > { %s415_s5 = sshll.u32 %s507_s4, 4  ;;  %s416_s5 = int_to_ptr.vmem [resolvable:$false] %s415_s5 }
  0x18   : > { %p413_p3 = pnand %p411_p2, %p399_p1  ;;  %s417_s12 = scalar_lea.vmem %s416_s5, 512 }
  0x19   : > { %p418_p6 = scmp.lt.s32.totalorder %s129_s29, %s416_s5  ;;  %p419_p7 = scmp.lt.s32.totalorder %s417_s12, %s410_s3 }
  0x1a   : > { %p414_p5 = pneg %p413_p3 }
  0x1b   : > { %p420_p10 = por %p419_p7, %p418_p6 }
  0x1d   : > { %p421_p4 = pnand %p420_p10, %p414_p5 }
  0x1f   : > { %424 = shalt.err (!%p421_p4)
}
  0x20   : > { %s508_s13 = smov 128   ;;  %s509_s15 = smov 8  }
  0x21   : > { %337 = dma.hbm_to_vmem [thread:$0]  (!%p593_p13), %s127_s27, 256, %s129_s29, %s115_s2, %s508_s13, %s508_s13, %s509_s15  }
  0x22   : > { %p136_p12 = scmp.lt.s32.totalorder %s505_s11, 9 }
  0x24   : > { %p137_p1 = pnand %p320_p0, %p136_p12 }
  0x25   : > { %s606_s16 = sand.u32 (!%p137_p1), 1, %s489_s7  }
  0x26   : > { %140 = sbr.rel (%p137_p1) target bundleno = 188 (0xbc), region = 24  ;;  %s321_s17 = sshll.u32 (!%p137_p1), %s606_s16, 4 }
  0x27   : > { %s143_s22 = scalar_lea.sflag (!%p137_p1), [#allocation3], %s606_s16  ;;  %s146_s23 = scalar_lea.vmem (!%p137_p1), [#allocation2], %s321_s17 }
  0x2b   : > { %476 = dma.done.wait (%p570_p8), %s143_s22, 256  }
  0x2c   : > { %478 = vsyncadd (%p570_p8), %s143_s22, 4294967040  ;;  %v167_v0 = vld [vmem:[%s146_s23] sm:$0xff]  ;;  %v168_v1 = vld [vmem:[%s146_s23 + $0x8] sm:$0xff]  ;;  %vm201_vm0 = vcmask 130048   ;;  %s164_s24 = scalar_lea.vmem [#allocation5], %s321_s17  ;;  %s329_s26 = sshll.u32 %s497_s9, 8 }
  0x2d   : > { %169 = vxpose.xlu0.b32.start [1/2] (short) (narrow) %v167_v0, 16  ;;  %s221_s25 = sshll.u32 %s164_s24, 4  ;;  %s620_s28 = scalar_lea.hbm %s668_s1, %s329_s26  ;;  %s615_s25 = int_to_ptr.vmem [resolvable:$true] %s221_s25 }
  0x2e   : > { %s205_s29 = scalar_lea.sflag [#allocation4], %s606_s16  ;;  %s425_s30 = scalar_lea.vmem %s615_s25, 256 }
  0x2f   : > { %p426_p8 = scmp.ne.s32.totalorder %s615_s25, %s425_s30  ;;  %s510_s9 = smov [#allocation5]  }
  0x30   : > { %s429_s2 = sshll.u32 %s510_s9, 4  ;;  %s430_s2 = int_to_ptr.vmem [resolvable:$false] %s429_s2 }
  0x31   : > { %170 = vxpose.xlu0.b32.end [2/2] (short) (narrow) %v168_v1, 16  ;;  %p427_p13 = pnand %p426_p8, %p574_p9  ;;  %s431_s3 = scalar_lea.vmem %s430_s2, 512 }
  0x32   : > { %p432_p2 = scmp.lt.s32.totalorder %s615_s25, %s430_s2  ;;  %p433_p3 = scmp.lt.s32.totalorder %s431_s3, %s425_s30 }
  0x33   : > { %p428_p0 = pneg %p427_p13 }
  0x34   : > { %p434_p5 = por %p433_p3, %p432_p2 }
  0x36   : > { %p435_p6 = pnand %p434_p5, %p428_p0 }
  0xa9   : > { %v185_v2 = vpop.trf.xlu0 }
  0xaa   : > { %202 = vst.msk [vmem:[%s164_s24] sm:$0xff] %vm201_vm0, %v185_v2 }
  0xad   : > { %v186_v3 = vpop.trf.xlu0 }
  0xae   : > { %203 = vst.msk [vmem:[%s164_s24 + $0x8] sm:$0xff] %vm201_vm0, %v186_v3 }
  0xaf   : > { %438 = shalt.err (!%p435_p6)
}
  0xb0   : > { %s439_s4 = scalar_lea.hbm %s620_s28, 256  ;;  %s443_s13 = scalar_lea.hbm %s668_s1, 2048 }
  0xb1   : > { %p440_p7 = scmp.ne.s32.totalorder %s620_s28, %s439_s4  ;;  %p444_p12 = scmp.lt.s32.totalorder %s620_s28, %s668_s1 }
  0xb2   : > { %p445_p1 = scmp.lt.s32.totalorder %s443_s13, %s439_s4 }
  0xb3   : > { %p441_p10 = pnand %p440_p7, %p574_p9 }
  0xb4   : > { %p446_p8 = por %p445_p1, %p444_p12 }
  0xb5   : > { %p442_p4 = pneg %p441_p10 }
  0xb7   : > { %p447_p13 = pnand %p446_p8, %p442_p4 }
  0xb9   : > { %450 = shalt.err (!%p447_p13)
}
  0xba   : > { %s511_s22 = smov 128   ;;  %s512_s23 = smov 8  }
  0xbb   : > { %332 = dma.vmem_to_hbm [thread:$0]  (%p574_p9), %s615_s25, 256, %s620_s28, %s205_s29, %s511_s22, %s511_s22, %s512_s23  }
  0xbc PF: > { %p343_p0 = scmp.ge.s32.totalorder %s505_s11, 2  ;;  %s236_s24 = sand.u32 1, %s485_s6  }
  0xbd   : > { %s237_s26 = scalar_lea.sflag [#allocation4], %s236_s24 }
  0xbe   : > { %p339_p2 = pnand %p343_p0, %p581_p11 }
  0xc0   : > { %p340_p3 = pneg %p339_p2 }
  0xc2   : > { %480 = dma.done.wait (%p340_p3), %s237_s26, 256  }
  0xc3   : > { %482 = vsyncadd (%p340_p3), %s237_s26, 4294967040  ;;  %s17_s11 = sadd.s32 1, %s505_s11   ;;  %s674_s6 = smov %s489_s7 }
  0xc4   : > { %p14_p5 = scmp.ge.s32.totalorder %s17_s11, 10   ;;  %s675_s7 = smov %s493_s8 }
  0xc5   : > { %s676_s8 = smov %s579_s20  ;;  %s677_s9 = smov %s501_s10 }
  0xc6   : > { %s678_s10 = smov %s680_s14  ;;  %16 = sbr.rel (!%p14_p5) target bundleno = 6 (0x6), region = 69 }
  0xcb   :  { %242 = vsyncpa [#allocation3], 1 }
  0xcc   :  { %244 = vsyncpa [#allocation3 + $0x1], 1 }
  0xcd   :  { %245 = vsyncpa [#allocation4], 1 }
  0xce   :  { %247 = vsyncpa [#allocation4 + $0x1], 1 }

</bundles_post_ra>
